<compile_context>
chip_gen: v7x
topology: tpu7x:2x2x1
jax: 0.10.0
libtpu: 0.0.40
codegen_flags: <defaults>
</compile_context>

<pallas_src>
import functools

import jax
import jax.numpy as jnp
import numpy as np
from jax.experimental import pallas as pl
from jax.experimental.pallas import tpu as pltpu


def _round_up(x, m):
    return ((x + m - 1) // m) * m


# ---------------------------------------------------------------------------
# Lane roll with jnp.roll semantics, preferring the XLU rotate (pltpu.roll).
# A one-off probe kernel determines the hardware op's shift convention; if the
# probe cannot run we fall back to jnp.roll (2 lane slices + concat).
# ---------------------------------------------------------------------------
def _make_roll_fn():
    def _probe_kernel(o_ref):
        idx = jax.lax.broadcasted_iota(jnp.int32, (8, 128), 1)
        o_ref[...] = pltpu.roll(idx, shift=1, axis=1)

    first = -1
    try:
        probe = pl.pallas_call(
            _probe_kernel,
            out_shape=jax.ShapeDtypeStruct((8, 128), jnp.int32),
        )()
        first = int(jax.device_get(probe)[0, 0])
    except Exception:
        first = -1

    if first == 127:          # pltpu.roll(x, s) == jnp.roll(x, s)
        def roll(x, s):
            s = s % x.shape[-1]
            return x if s == 0 else pltpu.roll(x, shift=s, axis=1)
        return roll
    if first == 1:            # opposite rotation convention
        def roll(x, s):
            s = (-s) % x.shape[-1]
            return x if s == 0 else pltpu.roll(x, shift=s, axis=1)
        return roll

    def roll(x, s):           # safe fallback
        s = s % x.shape[-1]
        return x if s == 0 else jnp.roll(x, s, axis=1)
    return roll


# ---------------------------------------------------------------------------
# In-kernel building block (operates on VMEM/vreg-resident values)
# ---------------------------------------------------------------------------
def _conv1d_same(x, w2d, *, K, pad_l, roll_fn, dot_dtype,
                 shift=None, relu=False, mask=None):
    """'Same'-padded stride-1 Conv1d over the batch-folded lane layout.

    x    : (Cin_pad, Wp) f32 activations; halo / pad lanes must be zero.
    w2d  : (Cout_pad, K*Cin_pad) tap-major flattened weight (BN scale folded).
    Computed as ONE MXU matmul against K lane-rolled copies of x stacked on
    the sublane axis (contraction dim = K*Cin_pad).
    """
    if K == 1:
        xs = x
    else:
        xs = jnp.concatenate([roll_fn(x, pad_l - j) for j in range(K)], axis=0)
    acc = jnp.dot(w2d.astype(dot_dtype), xs.astype(dot_dtype),
                  preferred_element_type=jnp.float32)
    if shift is not None:
        acc = acc + shift
    if relu:
        acc = jnp.maximum(acc, 0.0)
    if mask is not None:
        acc = acc * mask          # re-zero inter-batch halo / pad lanes
    return acc


def _fused_forward_kernel(*refs, plan, mask_idx, pool_idx, lin_w_idx,
                          lin_b_idx, roll_fn, dot_dtype):
    """Whole InceptionModel forward; activations never leave VMEM/vregs."""
    x_ref, out_ref = refs[0], refs[-1]
    p = [r[...] for r in refs[1:-1]]          # all parameters, loaded once
    mask = p[mask_idx]

    x = x_ref[...].astype(jnp.float32)        # (C_pad, Wp), halos already zero
    n_blocks = len(plan)
    # NOTE: fully unrolled at trace time -- fine for a few small blocks.  For
    # deep/wide configs move this loop under a grid axis / lax.fori_loop so
    # live ranges stay bounded (perf-review scaling note).
    for b, blk in enumerate(plan):
        last = (b == n_blocks - 1)
        org = x
        if blk["bottleneck"] is not None:
            # K=1 conv of a zero-halo input keeps the halos zero -> no mask.
            x = _conv1d_same(x, p[blk["bottleneck"]], K=1, pad_l=0,
                             roll_fn=roll_fn, dot_dtype=dot_dtype)
        (w0, k0, p0), (w1, k1, p1), (w2, k2, p2) = blk["convs"]
        # K>1 conv outputs spread into halo lanes; re-zero them so they keep
        # acting as "same" padding for the next K>1 conv.
        x = _conv1d_same(x, p[w0], K=k0, pad_l=p0, roll_fn=roll_fn,
                         dot_dtype=dot_dtype, mask=mask)
        x = _conv1d_same(x, p[w1], K=k1, pad_l=p1, roll_fn=roll_fn,
                         dot_dtype=dot_dtype, mask=mask)
        # last conv fused with folded inference-BatchNorm shift + ReLU
        x = _conv1d_same(x, p[w2], K=k2, pad_l=p2, roll_fn=roll_fn,
                         dot_dtype=dot_dtype, shift=p[blk["shift"]], relu=True)
        if blk["residual"] is not None:
            rw, rs = blk["residual"]          # residual branch fused + added
            x = x + _conv1d_same(org, p[rw], K=1, pad_l=0, roll_fn=roll_fn,
                                 dot_dtype=dot_dtype, shift=p[rs], relu=True)
        if not last:
            x = x * mask   # final block output feeds only the pooling matmul,
                           # whose matrix selects real lanes -> mask dropped
        # TODO(synk): nn.Dropout(p=0.4) is identity at inference; training-mode
        # stochastic dropout is not implemented.

    # mean over L per batch segment as a matmul with a precomputed (Wp, Np)
    # pooling matrix, fused with the Linear head (MXU is idle here).
    feat = jnp.dot(x, p[pool_idx], preferred_element_type=jnp.float32)   # (C, Np)
    out = (jnp.dot(p[lin_w_idx], feat, preferred_element_type=jnp.float32)
           + p[lin_b_idx])                                               # (Pp, Np)
    out_ref[...] = out.astype(out_ref.dtype)   # lane-dense padded store


# ---------------------------------------------------------------------------
# Host-side builder: fold BN, flatten + pad params, build the fused pallas_call
# ---------------------------------------------------------------------------
def make_fused_forward(params, N, L, dot_dtype=jnp.float32):
    """dot_dtype=jnp.bfloat16 halves MXU-operand / weight-VMEM traffic on
    v5e/v6e/v7x (elementwise math stays f32); re-validate the numerical
    tolerance before enabling it."""
    ksizes = [int(w.shape[2]) for blk in params["blocks"] for w in blk["conv_ws"]]
    Kmax = max(ksizes) if ksizes else 1
    OFF = (Kmax - 1) // 2            # left halo per batch segment
    S = L + Kmax - 1                 # lane stride per batch element
    W = N * S                        # folded batch+time lane width (real part)
    Wp = _round_up(W, 128)           # lane-dense activation width
    Np = _round_up(N, 128)           # lane-dense pooled-output width
    P = int(params["linear_w"].shape[0])
    Pp = _round_up(P, 8)
    cpad = lambda c: _round_up(max(int(c), 1), 8)   # sublane-aligned channels

    flat = []

    def add(a, dtype=jnp.float32):
        flat.append(jnp.asarray(a, dtype))
        return len(flat) - 1

    def add_conv(w, scale=None):
        """Fold optional BN scale; flatten (Cout,Cin,K) -> tap-major 2-D tile
        with both channel dims zero-padded to multiples of 8."""
        w = np.asarray(w, np.float32)
        if scale is not None:
            w = w * np.asarray(scale, np.float32)[:, None, None]
        cout, cin, K = w.shape
        co_p, ci_p = cpad(cout), cpad(cin)
        w2d = np.zeros((co_p, K * ci_p), np.float32)
        for j in range(K):
            w2d[:cout, j * ci_p:j * ci_p + cin] = w[:, :, j]
        return add(w2d, dot_dtype), K, (K - 1) // 2

    def add_shift(s, cout):
        sp = np.zeros((cpad(cout), 1), np.float32)
        sp[:cout, 0] = np.asarray(s, np.float32).reshape(-1)
        return add(sp)

    plan = []
    for blk in params["blocks"]:
        e = {"bottleneck": None, "residual": None}
        if "bottleneck_w" in blk:
            e["bottleneck"] = add_conv(blk["bottleneck_w"])[0]
        e["convs"] = (
            add_conv(blk["conv_ws"][0]),
            add_conv(blk["conv_ws"][1]),
            # inference-BatchNorm scale folded into the last conv's weights
            add_conv(blk["conv_ws"][2], scale=blk["bn_scale"]),
        )
        out_ch = int(blk["conv_ws"][2].shape[0])
        e["shift"] = add_shift(blk["bn_shift"], out_ch)
        if blk["residual"]:
            e["residual"] = (
                add_conv(blk["res_w"], scale=blk["res_bn_scale"])[0],
                add_shift(blk["res_bn_shift"], out_ch))
        plan.append(e)

    # halo mask + mean-over-L pooling matrix (host constants)
    mask_np = np.zeros((1, Wp), np.float32)
    pool_np = np.zeros((Wp, Np), np.float32)
    for n in range(N):
        start = OFF + n * S
        mask_np[0, start:start + L] = 1.0
        pool_np[start:start + L, n] = 1.0 / L
    mask_idx = add(mask_np)
    pool_idx = add(pool_np)

    c_last = int(params["linear_w"].shape[1])
    lin_w = np.zeros((Pp, cpad(c_last)), np.float32)
    lin_w[:P, :c_last] = np.asarray(params["linear_w"], np.float32)
    lin_b = np.zeros((Pp, 1), np.float32)
    lin_b[:P, 0] = np.asarray(params["linear_b"], np.float32).reshape(-1)
    lin_w_idx = add(lin_w)
    lin_b_idx = add(lin_b)

    roll_fn = _make_roll_fn()
    kernel = functools.partial(
        _fused_forward_kernel, plan=tuple(plan), mask_idx=mask_idx,
        pool_idx=pool_idx, lin_w_idx=lin_w_idx, lin_b_idx=lin_b_idx,
        roll_fn=roll_fn, dot_dtype=dot_dtype)

    # Gridless single call: everything (input, weights, activations) fits in
    # well under 1 MiB of VMEM, so no grid / tiling / vmem_limit request is
    # needed.  At production batch sizes, add a "parallel" grid axis over
    # whole batch segments so v7x's two TensorCores split the work.
    call = pl.pallas_call(
        kernel,
        out_shape=jax.ShapeDtypeStruct((Pp, Np), jnp.float32),
        in_specs=[pl.BlockSpec(memory_space=pltpu.MemorySpace.VMEM)
                  for _ in range(1 + len(flat))],
        out_specs=pl.BlockSpec(memory_space=pltpu.MemorySpace.VMEM),
    )

    def forward(x):
        # x: (N, Cin, L) PyTorch NCL layout.  One-time layout transform:
        # channel-major (Cin_pad, Wp), per-batch "same"-padding halos baked in,
        # channels padded to a sublane multiple, lanes padded up to 128.
        n, cin, l = x.shape
        assert n == N and l == L
        xt = jnp.transpose(x, (1, 0, 2))                        # (Cin, N, L)
        xp = jnp.pad(xt, ((0, 0), (0, 0), (OFF, S - OFF - L)))  # per-batch halo
        xw = xp.reshape(cin, W)                                 # (Cin, W)
        xw = jnp.pad(xw, ((0, cpad(cin) - cin), (0, Wp - W)))   # lane/sublane pad
        return call(xw, *flat)[:P, :N].T                        # (N, P)

    return forward


# ---------------------------------------------------------------------------
# Deterministic parameter construction (mirrors InceptionModel.__init__)
# ---------------------------------------------------------------------------
def init_inception_model(key, num_blocks, in_channels, out_channels,
                         bottleneck_channels, kernel_sizes, num_pred_classes):
    expand = lambda v: v if isinstance(v, list) else [v] * num_blocks
    out_channels = expand(out_channels)
    bottleneck_channels = expand(bottleneck_channels)
    kernel_sizes = expand(kernel_sizes)
    use_residuals = [i % 3 == 2 for i in range(num_blocks)]       # 'default'
    channels = [in_channels] + out_channels
    eps = 1e-5

    params = {"blocks": []}
    for i in range(num_blocks):
        key, *ks = jax.random.split(key, 8)
        in_ch, out_ch = channels[i], channels[i + 1]
        bott, ksz = bottleneck_channels[i], kernel_sizes[i]
        blk = {"residual": use_residuals[i]}
        if bott > 0:
            blk["bottleneck_w"] = (
                jax.random.normal(ks[0], (bott, in_ch, 1), jnp.float32)
                / np.sqrt(in_ch))
        kernel_size_s = [ksz // (2 ** j) for j in range(3)]
        conv_chs = [bott if bott > 0 else in_ch] + [out_ch] * 3
        blk["conv_ws"] = [
            jax.random.normal(
                ks[1 + j], (conv_chs[j + 1], conv_chs[j], kernel_size_s[j]),
                jnp.float32) / np.sqrt(conv_chs[j] * kernel_size_s[j])
            for j in range(3)
        ]
        # Inference-mode BatchNorm folded into scale/shift
        # (gamma=1, beta=0, running_mean=0, running_var=1 -> defaults).
        blk["bn_scale"] = jnp.ones((out_ch,), jnp.float32) / np.sqrt(1.0 + eps)
        blk["bn_shift"] = jnp.zeros((out_ch,), jnp.float32)
        if use_residuals[i]:
            blk["res_w"] = (
                jax.random.normal(ks[4], (out_ch, in_ch, 1), jnp.float32)
                / np.sqrt(in_ch))
            blk["res_bn_scale"] = jnp.ones((out_ch,), jnp.float32) / np.sqrt(1.0 + eps)
            blk["res_bn_shift"] = jnp.zeros((out_ch,), jnp.float32)
        params["blocks"].append(blk)

    key, k1, k2 = jax.random.split(key, 3)
    params["linear_w"] = (
        jax.random.normal(k1, (num_pred_classes, channels[-1]), jnp.float32)
        / np.sqrt(channels[-1]))
    params["linear_b"] = jax.random.normal(k2, (num_pred_classes,), jnp.float32) * 0.01
    return params


# ---------------------------------------------------------------------------
# Pure-JAX reference (unfolded math, no Pallas) for the correctness check
# ---------------------------------------------------------------------------
def _ref_conv1d_same(x, w, scale=None, shift=None, relu=False):
    N, Cin, L = x.shape
    Cout, _, K = w.shape
    xp = jnp.pad(x, ((0, 0), (0, 0), ((K - 1) // 2, K // 2)))
    out = jnp.zeros((N, Cout, L), jnp.float32)
    for j in range(K):
        out = out + jnp.einsum("oc,ncl->nol", w[:, :, j], xp[:, :, j:j + L])
    if scale is not None:
        out = out * scale[None, :, None] + shift[None, :, None]
    if relu:
        out = jnp.maximum(out, 0.0)
    return out


def _ref_forward(params, x):
    for blk in params["blocks"]:
        org = x
        if "bottleneck_w" in blk:
            x = _ref_conv1d_same(x, blk["bottleneck_w"])
        x = _ref_conv1d_same(x, blk["conv_ws"][0])
        x = _ref_conv1d_same(x, blk["conv_ws"][1])
        x = _ref_conv1d_same(x, blk["conv_ws"][2],
                             scale=blk["bn_scale"], shift=blk["bn_shift"],
                             relu=True)
        if blk["residual"]:
            x = x + _ref_conv1d_same(org, blk["res_w"],
                                     scale=blk["res_bn_scale"],
                                     shift=blk["res_bn_shift"], relu=True)
    feat = jnp.mean(x, axis=-1)
    return feat @ params["linear_w"].T + params["linear_b"][None, :]


# ---------------------------------------------------------------------------
if __name__ == "__main__":
    # Small config: 3 blocks, residual on block 2 (default pattern F,F,T).
    num_blocks = 3
    in_channels = 4
    out_channels = 8
    bottleneck_channels = 4
    kernel_sizes = 9            # per-block conv kernel sizes inside a block: [9, 4, 2]
    num_pred_classes = 3
    N, L = 2, 16

    key = jax.random.PRNGKey(0)
    k_param, k_x = jax.random.split(key)
    params = init_inception_model(k_param, num_blocks, in_channels,
                                  out_channels, bottleneck_channels,
                                  kernel_sizes, num_pred_classes)

    # input: (batch=2, in_channels=4, seq_len=16), NCL like torch Conv1d input.
    x = jax.random.normal(k_x, (N, in_channels, L), jnp.float32)

    forward = make_fused_forward(params, N=N, L=L)   # dot_dtype=jnp.bfloat16 for prod
    fwd = jax.jit(forward)
    out = fwd(x)
    jax.block_until_ready(out)

    ref = _ref_forward(params, x)
    np.testing.assert_allclose(np.asarray(out), np.asarray(ref),
                               rtol=1e-4, atol=1e-5)

    assert out.shape == (N, num_pred_classes)
    print("KERNEL_OK")
</pallas_src>

<mosaic_0001>
module attributes {stable_mosaic.version = 11 : i64} {
  func.func @_fused_forward_kernel(%arg0: memref<8x128xf32, #tpu.memory_space<vmem>>, %arg1: memref<8x8xf32, #tpu.memory_space<vmem>>, %arg2: memref<8x72xf32, #tpu.memory_space<vmem>>, %arg3: memref<8x32xf32, #tpu.memory_space<vmem>>, %arg4: memref<8x16xf32, #tpu.memory_space<vmem>>, %arg5: memref<8x1xf32, #tpu.memory_space<vmem>>, %arg6: memref<8x8xf32, #tpu.memory_space<vmem>>, %arg7: memref<8x72xf32, #tpu.memory_space<vmem>>, %arg8: memref<8x32xf32, #tpu.memory_space<vmem>>, %arg9: memref<8x16xf32, #tpu.memory_space<vmem>>, %arg10: memref<8x1xf32, #tpu.memory_space<vmem>>, %arg11: memref<8x8xf32, #tpu.memory_space<vmem>>, %arg12: memref<8x72xf32, #tpu.memory_space<vmem>>, %arg13: memref<8x32xf32, #tpu.memory_space<vmem>>, %arg14: memref<8x16xf32, #tpu.memory_space<vmem>>, %arg15: memref<8x1xf32, #tpu.memory_space<vmem>>, %arg16: memref<8x8xf32, #tpu.memory_space<vmem>>, %arg17: memref<8x1xf32, #tpu.memory_space<vmem>>, %arg18: memref<1x128xf32, #tpu.memory_space<vmem>>, %arg19: memref<128x128xf32, #tpu.memory_space<vmem>>, %arg20: memref<8x8xf32, #tpu.memory_space<vmem>>, %arg21: memref<8x1xf32, #tpu.memory_space<vmem>>, %arg22: memref<8x128xf32, #tpu.memory_space<vmem>>) attributes {dimension_semantics = [], scalar_prefetch = 0 : i64, scratch_operands = 0 : i64, tpu.core_type = #tpu.core_type<tc>} {
    %c0 = arith.constant 0 : index
    %c0_0 = arith.constant 0 : index
    %0 = vector.load %arg1[%c0, %c0_0] : memref<8x8xf32, #tpu.memory_space<vmem>>, vector<8x8xf32>
    %c0_1 = arith.constant 0 : index
    %c0_2 = arith.constant 0 : index
    %1 = vector.load %arg2[%c0_1, %c0_2] : memref<8x72xf32, #tpu.memory_space<vmem>>, vector<8x72xf32>
    %c0_3 = arith.constant 0 : index
    %c0_4 = arith.constant 0 : index
    %2 = vector.load %arg3[%c0_3, %c0_4] : memref<8x32xf32, #tpu.memory_space<vmem>>, vector<8x32xf32>
    %c0_5 = arith.constant 0 : index
    %c0_6 = arith.constant 0 : index
    %3 = vector.load %arg4[%c0_5, %c0_6] : memref<8x16xf32, #tpu.memory_space<vmem>>, vector<8x16xf32>
    %c0_7 = arith.constant 0 : index
    %c0_8 = arith.constant 0 : index
    %4 = vector.load %arg5[%c0_7, %c0_8] : memref<8x1xf32, #tpu.memory_space<vmem>>, vector<8x1xf32>
    %c0_9 = arith.constant 0 : index
    %c0_10 = arith.constant 0 : index
    %5 = vector.load %arg6[%c0_9, %c0_10] : memref<8x8xf32, #tpu.memory_space<vmem>>, vector<8x8xf32>
    %c0_11 = arith.constant 0 : index
    %c0_12 = arith.constant 0 : index
    %6 = vector.load %arg7[%c0_11, %c0_12] : memref<8x72xf32, #tpu.memory_space<vmem>>, vector<8x72xf32>
    %c0_13 = arith.constant 0 : index
    %c0_14 = arith.constant 0 : index
    %7 = vector.load %arg8[%c0_13, %c0_14] : memref<8x32xf32, #tpu.memory_space<vmem>>, vector<8x32xf32>
    %c0_15 = arith.constant 0 : index
    %c0_16 = arith.constant 0 : index
    %8 = vector.load %arg9[%c0_15, %c0_16] : memref<8x16xf32, #tpu.memory_space<vmem>>, vector<8x16xf32>
    %c0_17 = arith.constant 0 : index
    %c0_18 = arith.constant 0 : index
    %9 = vector.load %arg10[%c0_17, %c0_18] : memref<8x1xf32, #tpu.memory_space<vmem>>, vector<8x1xf32>
    %c0_19 = arith.constant 0 : index
    %c0_20 = arith.constant 0 : index
    %10 = vector.load %arg11[%c0_19, %c0_20] : memref<8x8xf32, #tpu.memory_space<vmem>>, vector<8x8xf32>
    %c0_21 = arith.constant 0 : index
    %c0_22 = arith.constant 0 : index
    %11 = vector.load %arg12[%c0_21, %c0_22] : memref<8x72xf32, #tpu.memory_space<vmem>>, vector<8x72xf32>
    %c0_23 = arith.constant 0 : index
    %c0_24 = arith.constant 0 : index
    %12 = vector.load %arg13[%c0_23, %c0_24] : memref<8x32xf32, #tpu.memory_space<vmem>>, vector<8x32xf32>
    %c0_25 = arith.constant 0 : index
    %c0_26 = arith.constant 0 : index
    %13 = vector.load %arg14[%c0_25, %c0_26] : memref<8x16xf32, #tpu.memory_space<vmem>>, vector<8x16xf32>
    %c0_27 = arith.constant 0 : index
    %c0_28 = arith.constant 0 : index
    %14 = vector.load %arg15[%c0_27, %c0_28] : memref<8x1xf32, #tpu.memory_space<vmem>>, vector<8x1xf32>
    %c0_29 = arith.constant 0 : index
    %c0_30 = arith.constant 0 : index
    %15 = vector.load %arg16[%c0_29, %c0_30] : memref<8x8xf32, #tpu.memory_space<vmem>>, vector<8x8xf32>
    %c0_31 = arith.constant 0 : index
    %c0_32 = arith.constant 0 : index
    %16 = vector.load %arg17[%c0_31, %c0_32] : memref<8x1xf32, #tpu.memory_space<vmem>>, vector<8x1xf32>
    %c0_33 = arith.constant 0 : index
    %c0_34 = arith.constant 0 : index
    %17 = vector.load %arg18[%c0_33, %c0_34] : memref<1x128xf32, #tpu.memory_space<vmem>>, vector<1x128xf32>
    %c0_35 = arith.constant 0 : index
    %c0_36 = arith.constant 0 : index
    %18 = vector.load %arg19[%c0_35, %c0_36] : memref<128x128xf32, #tpu.memory_space<vmem>>, vector<128x128xf32>
    %c0_37 = arith.constant 0 : index
    %c0_38 = arith.constant 0 : index
    %19 = vector.load %arg20[%c0_37, %c0_38] : memref<8x8xf32, #tpu.memory_space<vmem>>, vector<8x8xf32>
    %c0_39 = arith.constant 0 : index
    %c0_40 = arith.constant 0 : index
    %20 = vector.load %arg21[%c0_39, %c0_40] : memref<8x1xf32, #tpu.memory_space<vmem>>, vector<8x1xf32>
    %c0_41 = arith.constant 0 : index
    %c0_42 = arith.constant 0 : index
    %21 = vector.load %arg0[%c0_41, %c0_42] : memref<8x128xf32, #tpu.memory_space<vmem>>, vector<8x128xf32>
    %cst = arith.constant dense<0.000000e+00> : vector<8x128xf32>
    %22 = tpu.matmul %0, %21, %cst {dimension_numbers = #tpu.dot_dimension_numbers<[1], [0], [0], [1], [0, 0, 1, 1], [], []>} : vector<8x8xf32>, vector<8x128xf32>, vector<8x128xf32> -> vector<8x128xf32>
    %23 = vector.extract_strided_slice %22 {offsets = [0, 124], sizes = [8, 4], strides = [1, 1]} : vector<8x128xf32> to vector<8x4xf32>
    %24 = vector.extract_strided_slice %22 {offsets = [0, 0], sizes = [8, 124], strides = [1, 1]} : vector<8x128xf32> to vector<8x124xf32>
    %25 = tpu.concatenate %23, %24 in 1 : vector<8x4xf32>, vector<8x124xf32> -> vector<8x128xf32>
    %26 = vector.extract_strided_slice %22 {offsets = [0, 125], sizes = [8, 3], strides = [1, 1]} : vector<8x128xf32> to vector<8x3xf32>
    %27 = vector.extract_strided_slice %22 {offsets = [0, 0], sizes = [8, 125], strides = [1, 1]} : vector<8x128xf32> to vector<8x125xf32>
    %28 = tpu.concatenate %26, %27 in 1 : vector<8x3xf32>, vector<8x125xf32> -> vector<8x128xf32>
    %29 = vector.extract_strided_slice %22 {offsets = [0, 126], sizes = [8, 2], strides = [1, 1]} : vector<8x128xf32> to vector<8x2xf32>
    %30 = vector.extract_strided_slice %22 {offsets = [0, 0], sizes = [8, 126], strides = [1, 1]} : vector<8x128xf32> to vector<8x126xf32>
    %31 = tpu.concatenate %29, %30 in 1 : vector<8x2xf32>, vector<8x126xf32> -> vector<8x128xf32>
    %32 = vector.extract_strided_slice %22 {offsets = [0, 127], sizes = [8, 1], strides = [1, 1]} : vector<8x128xf32> to vector<8x1xf32>
    %33 = vector.extract_strided_slice %22 {offsets = [0, 0], sizes = [8, 127], strides = [1, 1]} : vector<8x128xf32> to vector<8x127xf32>
    %34 = tpu.concatenate %32, %33 in 1 : vector<8x1xf32>, vector<8x127xf32> -> vector<8x128xf32>
    %35 = vector.extract_strided_slice %22 {offsets = [0, 1], sizes = [8, 127], strides = [1, 1]} : vector<8x128xf32> to vector<8x127xf32>
    %36 = vector.extract_strided_slice %22 {offsets = [0, 0], sizes = [8, 1], strides = [1, 1]} : vector<8x128xf32> to vector<8x1xf32>
    %37 = tpu.concatenate %35, %36 in 1 : vector<8x127xf32>, vector<8x1xf32> -> vector<8x128xf32>
    %38 = vector.extract_strided_slice %22 {offsets = [0, 2], sizes = [8, 126], strides = [1, 1]} : vector<8x128xf32> to vector<8x126xf32>
    %39 = vector.extract_strided_slice %22 {offsets = [0, 0], sizes = [8, 2], strides = [1, 1]} : vector<8x128xf32> to vector<8x2xf32>
    %40 = tpu.concatenate %38, %39 in 1 : vector<8x126xf32>, vector<8x2xf32> -> vector<8x128xf32>
    %41 = vector.extract_strided_slice %22 {offsets = [0, 3], sizes = [8, 125], strides = [1, 1]} : vector<8x128xf32> to vector<8x125xf32>
    %42 = vector.extract_strided_slice %22 {offsets = [0, 0], sizes = [8, 3], strides = [1, 1]} : vector<8x128xf32> to vector<8x3xf32>
    %43 = tpu.concatenate %41, %42 in 1 : vector<8x125xf32>, vector<8x3xf32> -> vector<8x128xf32>
    %44 = vector.extract_strided_slice %22 {offsets = [0, 4], sizes = [8, 124], strides = [1, 1]} : vector<8x128xf32> to vector<8x124xf32>
    %45 = vector.extract_strided_slice %22 {offsets = [0, 0], sizes = [8, 4], strides = [1, 1]} : vector<8x128xf32> to vector<8x4xf32>
    %46 = tpu.concatenate %44, %45 in 1 : vector<8x124xf32>, vector<8x4xf32> -> vector<8x128xf32>
    %47 = tpu.concatenate %25, %28, %31, %34, %22, %37, %40, %43, %46 in 0 : vector<8x128xf32>, vector<8x128xf32>, vector<8x128xf32>, vector<8x128xf32>, vector<8x128xf32>, vector<8x128xf32>, vector<8x128xf32>, vector<8x128xf32>, vector<8x128xf32> -> vector<72x128xf32>
    %cst_43 = arith.constant dense<0.000000e+00> : vector<8x128xf32>
    %48 = tpu.matmul %1, %47, %cst_43 {dimension_numbers = #tpu.dot_dimension_numbers<[1], [0], [0], [1], [0, 0, 1, 1], [], []>} : vector<8x72xf32>, vector<72x128xf32>, vector<8x128xf32> -> vector<8x128xf32>
    %49 = vector.broadcast %17 : vector<1x128xf32> to vector<8x128xf32>
    %50 = arith.mulf %48, %49 : vector<8x128xf32>
    %51 = vector.extract_strided_slice %50 {offsets = [0, 127], sizes = [8, 1], strides = [1, 1]} : vector<8x128xf32> to vector<8x1xf32>
    %52 = vector.extract_strided_slice %50 {offsets = [0, 0], sizes = [8, 127], strides = [1, 1]} : vector<8x128xf32> to vector<8x127xf32>
    %53 = tpu.concatenate %51, %52 in 1 : vector<8x1xf32>, vector<8x127xf32> -> vector<8x128xf32>
    %54 = vector.extract_strided_slice %50 {offsets = [0, 1], sizes = [8, 127], strides = [1, 1]} : vector<8x128xf32> to vector<8x127xf32>
    %55 = vector.extract_strided_slice %50 {offsets = [0, 0], sizes = [8, 1], strides = [1, 1]} : vector<8x128xf32> to vector<8x1xf32>
    %56 = tpu.concatenate %54, %55 in 1 : vector<8x127xf32>, vector<8x1xf32> -> vector<8x128xf32>
    %57 = vector.extract_strided_slice %50 {offsets = [0, 2], sizes = [8, 126], strides = [1, 1]} : vector<8x128xf32> to vector<8x126xf32>
    %58 = vector.extract_strided_slice %50 {offsets = [0, 0], sizes = [8, 2], strides = [1, 1]} : vector<8x128xf32> to vector<8x2xf32>
    %59 = tpu.concatenate %57, %58 in 1 : vector<8x126xf32>, vector<8x2xf32> -> vector<8x128xf32>
    %60 = tpu.concatenate %53, %50, %56, %59 in 0 : vector<8x128xf32>, vector<8x128xf32>, vector<8x128xf32>, vector<8x128xf32> -> vector<32x128xf32>
    %cst_44 = arith.constant dense<0.000000e+00> : vector<8x128xf32>
    %61 = tpu.matmul %2, %60, %cst_44 {dimension_numbers = #tpu.dot_dimension_numbers<[1], [0], [0], [1], [0, 0, 1, 1], [], []>} : vector<8x32xf32>, vector<32x128xf32>, vector<8x128xf32> -> vector<8x128xf32>
    %62 = vector.broadcast %17 : vector<1x128xf32> to vector<8x128xf32>
    %63 = arith.mulf %61, %62 : vector<8x128xf32>
    %64 = vector.extract_strided_slice %63 {offsets = [0, 1], sizes = [8, 127], strides = [1, 1]} : vector<8x128xf32> to vector<8x127xf32>
    %65 = vector.extract_strided_slice %63 {offsets = [0, 0], sizes = [8, 1], strides = [1, 1]} : vector<8x128xf32> to vector<8x1xf32>
    %66 = tpu.concatenate %64, %65 in 1 : vector<8x127xf32>, vector<8x1xf32> -> vector<8x128xf32>
    %67 = tpu.concatenate %63, %66 in 0 : vector<8x128xf32>, vector<8x128xf32> -> vector<16x128xf32>
    %cst_45 = arith.constant dense<0.000000e+00> : vector<8x128xf32>
    %68 = tpu.matmul %3, %67, %cst_45 {dimension_numbers = #tpu.dot_dimension_numbers<[1], [0], [0], [1], [0, 0, 1, 1], [], []>} : vector<8x16xf32>, vector<16x128xf32>, vector<8x128xf32> -> vector<8x128xf32>
    %69 = vector.broadcast %4 : vector<8x1xf32> to vector<8x128xf32>
    %70 = arith.addf %68, %69 : vector<8x128xf32>
    %cst_46 = arith.constant 0.000000e+00 : f32
    %71 = vector.broadcast %cst_46 : f32 to vector<8x128xf32>
    %72 = arith.maximumf %70, %71 : vector<8x128xf32>
    %73 = vector.broadcast %17 : vector<1x128xf32> to vector<8x128xf32>
    %74 = arith.mulf %72, %73 : vector<8x128xf32>
    %cst_47 = arith.constant dense<0.000000e+00> : vector<8x128xf32>
    %75 = tpu.matmul %5, %74, %cst_47 {dimension_numbers = #tpu.dot_dimension_numbers<[1], [0], [0], [1], [0, 0, 1, 1], [], []>} : vector<8x8xf32>, vector<8x128xf32>, vector<8x128xf32> -> vector<8x128xf32>
    %76 = vector.extract_strided_slice %75 {offsets = [0, 124], sizes = [8, 4], strides = [1, 1]} : vector<8x128xf32> to vector<8x4xf32>
    %77 = vector.extract_strided_slice %75 {offsets = [0, 0], sizes = [8, 124], strides = [1, 1]} : vector<8x128xf32> to vector<8x124xf32>
    %78 = tpu.concatenate %76, %77 in 1 : vector<8x4xf32>, vector<8x124xf32> -> vector<8x128xf32>
    %79 = vector.extract_strided_slice %75 {offsets = [0, 125], sizes = [8, 3], strides = [1, 1]} : vector<8x128xf32> to vector<8x3xf32>
    %80 = vector.extract_strided_slice %75 {offsets = [0, 0], sizes = [8, 125], strides = [1, 1]} : vector<8x128xf32> to vector<8x125xf32>
    %81 = tpu.concatenate %79, %80 in 1 : vector<8x3xf32>, vector<8x125xf32> -> vector<8x128xf32>
    %82 = vector.extract_strided_slice %75 {offsets = [0, 126], sizes = [8, 2], strides = [1, 1]} : vector<8x128xf32> to vector<8x2xf32>
    %83 = vector.extract_strided_slice %75 {offsets = [0, 0], sizes = [8, 126], strides = [1, 1]} : vector<8x128xf32> to vector<8x126xf32>
    %84 = tpu.concatenate %82, %83 in 1 : vector<8x2xf32>, vector<8x126xf32> -> vector<8x128xf32>
    %85 = vector.extract_strided_slice %75 {offsets = [0, 127], sizes = [8, 1], strides = [1, 1]} : vector<8x128xf32> to vector<8x1xf32>
    %86 = vector.extract_strided_slice %75 {offsets = [0, 0], sizes = [8, 127], strides = [1, 1]} : vector<8x128xf32> to vector<8x127xf32>
    %87 = tpu.concatenate %85, %86 in 1 : vector<8x1xf32>, vector<8x127xf32> -> vector<8x128xf32>
    %88 = vector.extract_strided_slice %75 {offsets = [0, 1], sizes = [8, 127], strides = [1, 1]} : vector<8x128xf32> to vector<8x127xf32>
    %89 = vector.extract_strided_slice %75 {offsets = [0, 0], sizes = [8, 1], strides = [1, 1]} : vector<8x128xf32> to vector<8x1xf32>
    %90 = tpu.concatenate %88, %89 in 1 : vector<8x127xf32>, vector<8x1xf32> -> vector<8x128xf32>
    %91 = vector.extract_strided_slice %75 {offsets = [0, 2], sizes = [8, 126], strides = [1, 1]} : vector<8x128xf32> to vector<8x126xf32>
    %92 = vector.extract_strided_slice %75 {offsets = [0, 0], sizes = [8, 2], strides = [1, 1]} : vector<8x128xf32> to vector<8x2xf32>
    %93 = tpu.concatenate %91, %92 in 1 : vector<8x126xf32>, vector<8x2xf32> -> vector<8x128xf32>
    %94 = vector.extract_strided_slice %75 {offsets = [0, 3], sizes = [8, 125], strides = [1, 1]} : vector<8x128xf32> to vector<8x125xf32>
    %95 = vector.extract_strided_slice %75 {offsets = [0, 0], sizes = [8, 3], strides = [1, 1]} : vector<8x128xf32> to vector<8x3xf32>
    %96 = tpu.concatenate %94, %95 in 1 : vector<8x125xf32>, vector<8x3xf32> -> vector<8x128xf32>
    %97 = vector.extract_strided_slice %75 {offsets = [0, 4], sizes = [8, 124], strides = [1, 1]} : vector<8x128xf32> to vector<8x124xf32>
    %98 = vector.extract_strided_slice %75 {offsets = [0, 0], sizes = [8, 4], strides = [1, 1]} : vector<8x128xf32> to vector<8x4xf32>
    %99 = tpu.concatenate %97, %98 in 1 : vector<8x124xf32>, vector<8x4xf32> -> vector<8x128xf32>
    %100 = tpu.concatenate %78, %81, %84, %87, %75, %90, %93, %96, %99 in 0 : vector<8x128xf32>, vector<8x128xf32>, vector<8x128xf32>, vector<8x128xf32>, vector<8x128xf32>, vector<8x128xf32>, vector<8x128xf32>, vector<8x128xf32>, vector<8x128xf32> -> vector<72x128xf32>
    %cst_48 = arith.constant dense<0.000000e+00> : vector<8x128xf32>
    %101 = tpu.matmul %6, %100, %cst_48 {dimension_numbers = #tpu.dot_dimension_numbers<[1], [0], [0], [1], [0, 0, 1, 1], [], []>} : vector<8x72xf32>, vector<72x128xf32>, vector<8x128xf32> -> vector<8x128xf32>
    %102 = vector.broadcast %17 : vector<1x128xf32> to vector<8x128xf32>
    %103 = arith.mulf %101, %102 : vector<8x128xf32>
    %104 = vector.extract_strided_slice %103 {offsets = [0, 127], sizes = [8, 1], strides = [1, 1]} : vector<8x128xf32> to vector<8x1xf32>
    %105 = vector.extract_strided_slice %103 {offsets = [0, 0], sizes = [8, 127], strides = [1, 1]} : vector<8x128xf32> to vector<8x127xf32>
    %106 = tpu.concatenate %104, %105 in 1 : vector<8x1xf32>, vector<8x127xf32> -> vector<8x128xf32>
    %107 = vector.extract_strided_slice %103 {offsets = [0, 1], sizes = [8, 127], strides = [1, 1]} : vector<8x128xf32> to vector<8x127xf32>
    %108 = vector.extract_strided_slice %103 {offsets = [0, 0], sizes = [8, 1], strides = [1, 1]} : vector<8x128xf32> to vector<8x1xf32>
    %109 = tpu.concatenate %107, %108 in 1 : vector<8x127xf32>, vector<8x1xf32> -> vector<8x128xf32>
    %110 = vector.extract_strided_slice %103 {offsets = [0, 2], sizes = [8, 126], strides = [1, 1]} : vector<8x128xf32> to vector<8x126xf32>
    %111 = vector.extract_strided_slice %103 {offsets = [0, 0], sizes = [8, 2], strides = [1, 1]} : vector<8x128xf32> to vector<8x2xf32>
    %112 = tpu.concatenate %110, %111 in 1 : vector<8x126xf32>, vector<8x2xf32> -> vector<8x128xf32>
    %113 = tpu.concatenate %106, %103, %109, %112 in 0 : vector<8x128xf32>, vector<8x128xf32>, vector<8x128xf32>, vector<8x128xf32> -> vector<32x128xf32>
    %cst_49 = arith.constant dense<0.000000e+00> : vector<8x128xf32>
    %114 = tpu.matmul %7, %113, %cst_49 {dimension_numbers = #tpu.dot_dimension_numbers<[1], [0], [0], [1], [0, 0, 1, 1], [], []>} : vector<8x32xf32>, vector<32x128xf32>, vector<8x128xf32> -> vector<8x128xf32>
    %115 = vector.broadcast %17 : vector<1x128xf32> to vector<8x128xf32>
    %116 = arith.mulf %114, %115 : vector<8x128xf32>
    %117 = vector.extract_strided_slice %116 {offsets = [0, 1], sizes = [8, 127], strides = [1, 1]} : vector<8x128xf32> to vector<8x127xf32>
    %118 = vector.extract_strided_slice %116 {offsets = [0, 0], sizes = [8, 1], strides = [1, 1]} : vector<8x128xf32> to vector<8x1xf32>
    %119 = tpu.concatenate %117, %118 in 1 : vector<8x127xf32>, vector<8x1xf32> -> vector<8x128xf32>
    %120 = tpu.concatenate %116, %119 in 0 : vector<8x128xf32>, vector<8x128xf32> -> vector<16x128xf32>
    %cst_50 = arith.constant dense<0.000000e+00> : vector<8x128xf32>
    %121 = tpu.matmul %8, %120, %cst_50 {dimension_numbers = #tpu.dot_dimension_numbers<[1], [0], [0], [1], [0, 0, 1, 1], [], []>} : vector<8x16xf32>, vector<16x128xf32>, vector<8x128xf32> -> vector<8x128xf32>
    %122 = vector.broadcast %9 : vector<8x1xf32> to vector<8x128xf32>
    %123 = arith.addf %121, %122 : vector<8x128xf32>
    %cst_51 = arith.constant 0.000000e+00 : f32
    %124 = vector.broadcast %cst_51 : f32 to vector<8x128xf32>
    %125 = arith.maximumf %123, %124 : vector<8x128xf32>
    %126 = vector.broadcast %17 : vector<1x128xf32> to vector<8x128xf32>
    %127 = arith.mulf %125, %126 : vector<8x128xf32>
    %cst_52 = arith.constant dense<0.000000e+00> : vector<8x128xf32>
    %128 = tpu.matmul %10, %127, %cst_52 {dimension_numbers = #tpu.dot_dimension_numbers<[1], [0], [0], [1], [0, 0, 1, 1], [], []>} : vector<8x8xf32>, vector<8x128xf32>, vector<8x128xf32> -> vector<8x128xf32>
    %129 = vector.extract_strided_slice %128 {offsets = [0, 124], sizes = [8, 4], strides = [1, 1]} : vector<8x128xf32> to vector<8x4xf32>
    %130 = vector.extract_strided_slice %128 {offsets = [0, 0], sizes = [8, 124], strides = [1, 1]} : vector<8x128xf32> to vector<8x124xf32>
    %131 = tpu.concatenate %129, %130 in 1 : vector<8x4xf32>, vector<8x124xf32> -> vector<8x128xf32>
    %132 = vector.extract_strided_slice %128 {offsets = [0, 125], sizes = [8, 3], strides = [1, 1]} : vector<8x128xf32> to vector<8x3xf32>
    %133 = vector.extract_strided_slice %128 {offsets = [0, 0], sizes = [8, 125], strides = [1, 1]} : vector<8x128xf32> to vector<8x125xf32>
    %134 = tpu.concatenate %132, %133 in 1 : vector<8x3xf32>, vector<8x125xf32> -> vector<8x128xf32>
    %135 = vector.extract_strided_slice %128 {offsets = [0, 126], sizes = [8, 2], strides = [1, 1]} : vector<8x128xf32> to vector<8x2xf32>
    %136 = vector.extract_strided_slice %128 {offsets = [0, 0], sizes = [8, 126], strides = [1, 1]} : vector<8x128xf32> to vector<8x126xf32>
    %137 = tpu.concatenate %135, %136 in 1 : vector<8x2xf32>, vector<8x126xf32> -> vector<8x128xf32>
    %138 = vector.extract_strided_slice %128 {offsets = [0, 127], sizes = [8, 1], strides = [1, 1]} : vector<8x128xf32> to vector<8x1xf32>
    %139 = vector.extract_strided_slice %128 {offsets = [0, 0], sizes = [8, 127], strides = [1, 1]} : vector<8x128xf32> to vector<8x127xf32>
    %140 = tpu.concatenate %138, %139 in 1 : vector<8x1xf32>, vector<8x127xf32> -> vector<8x128xf32>
    %141 = vector.extract_strided_slice %128 {offsets = [0, 1], sizes = [8, 127], strides = [1, 1]} : vector<8x128xf32> to vector<8x127xf32>
    %142 = vector.extract_strided_slice %128 {offsets = [0, 0], sizes = [8, 1], strides = [1, 1]} : vector<8x128xf32> to vector<8x1xf32>
    %143 = tpu.concatenate %141, %142 in 1 : vector<8x127xf32>, vector<8x1xf32> -> vector<8x128xf32>
    %144 = vector.extract_strided_slice %128 {offsets = [0, 2], sizes = [8, 126], strides = [1, 1]} : vector<8x128xf32> to vector<8x126xf32>
    %145 = vector.extract_strided_slice %128 {offsets = [0, 0], sizes = [8, 2], strides = [1, 1]} : vector<8x128xf32> to vector<8x2xf32>
    %146 = tpu.concatenate %144, %145 in 1 : vector<8x126xf32>, vector<8x2xf32> -> vector<8x128xf32>
    %147 = vector.extract_strided_slice %128 {offsets = [0, 3], sizes = [8, 125], strides = [1, 1]} : vector<8x128xf32> to vector<8x125xf32>
    %148 = vector.extract_strided_slice %128 {offsets = [0, 0], sizes = [8, 3], strides = [1, 1]} : vector<8x128xf32> to vector<8x3xf32>
    %149 = tpu.concatenate %147, %148 in 1 : vector<8x125xf32>, vector<8x3xf32> -> vector<8x128xf32>
    %150 = vector.extract_strided_slice %128 {offsets = [0, 4], sizes = [8, 124], strides = [1, 1]} : vector<8x128xf32> to vector<8x124xf32>
    %151 = vector.extract_strided_slice %128 {offsets = [0, 0], sizes = [8, 4], strides = [1, 1]} : vector<8x128xf32> to vector<8x4xf32>
    %152 = tpu.concatenate %150, %151 in 1 : vector<8x124xf32>, vector<8x4xf32> -> vector<8x128xf32>
    %153 = tpu.concatenate %131, %134, %137, %140, %128, %143, %146, %149, %152 in 0 : vector<8x128xf32>, vector<8x128xf32>, vector<8x128xf32>, vector<8x128xf32>, vector<8x128xf32>, vector<8x128xf32>, vector<8x128xf32>, vector<8x128xf32>, vector<8x128xf32> -> vector<72x128xf32>
    %cst_53 = arith.constant dense<0.000000e+00> : vector<8x128xf32>
    %154 = tpu.matmul %11, %153, %cst_53 {dimension_numbers = #tpu.dot_dimension_numbers<[1], [0], [0], [1], [0, 0, 1, 1], [], []>} : vector<8x72xf32>, vector<72x128xf32>, vector<8x128xf32> -> vector<8x128xf32>
    %155 = vector.broadcast %17 : vector<1x128xf32> to vector<8x128xf32>
    %156 = arith.mulf %154, %155 : vector<8x128xf32>
    %157 = vector.extract_strided_slice %156 {offsets = [0, 127], sizes = [8, 1], strides = [1, 1]} : vector<8x128xf32> to vector<8x1xf32>
    %158 = vector.extract_strided_slice %156 {offsets = [0, 0], sizes = [8, 127], strides = [1, 1]} : vector<8x128xf32> to vector<8x127xf32>
    %159 = tpu.concatenate %157, %158 in 1 : vector<8x1xf32>, vector<8x127xf32> -> vector<8x128xf32>
    %160 = vector.extract_strided_slice %156 {offsets = [0, 1], sizes = [8, 127], strides = [1, 1]} : vector<8x128xf32> to vector<8x127xf32>
    %161 = vector.extract_strided_slice %156 {offsets = [0, 0], sizes = [8, 1], strides = [1, 1]} : vector<8x128xf32> to vector<8x1xf32>
    %162 = tpu.concatenate %160, %161 in 1 : vector<8x127xf32>, vector<8x1xf32> -> vector<8x128xf32>
    %163 = vector.extract_strided_slice %156 {offsets = [0, 2], sizes = [8, 126], strides = [1, 1]} : vector<8x128xf32> to vector<8x126xf32>
    %164 = vector.extract_strided_slice %156 {offsets = [0, 0], sizes = [8, 2], strides = [1, 1]} : vector<8x128xf32> to vector<8x2xf32>
    %165 = tpu.concatenate %163, %164 in 1 : vector<8x126xf32>, vector<8x2xf32> -> vector<8x128xf32>
    %166 = tpu.concatenate %159, %156, %162, %165 in 0 : vector<8x128xf32>, vector<8x128xf32>, vector<8x128xf32>, vector<8x128xf32> -> vector<32x128xf32>
    %cst_54 = arith.constant dense<0.000000e+00> : vector<8x128xf32>
    %167 = tpu.matmul %12, %166, %cst_54 {dimension_numbers = #tpu.dot_dimension_numbers<[1], [0], [0], [1], [0, 0, 1, 1], [], []>} : vector<8x32xf32>, vector<32x128xf32>, vector<8x128xf32> -> vector<8x128xf32>
    %168 = vector.broadcast %17 : vector<1x128xf32> to vector<8x128xf32>
    %169 = arith.mulf %167, %168 : vector<8x128xf32>
    %170 = vector.extract_strided_slice %169 {offsets = [0, 1], sizes = [8, 127], strides = [1, 1]} : vector<8x128xf32> to vector<8x127xf32>
    %171 = vector.extract_strided_slice %169 {offsets = [0, 0], sizes = [8, 1], strides = [1, 1]} : vector<8x128xf32> to vector<8x1xf32>
    %172 = tpu.concatenate %170, %171 in 1 : vector<8x127xf32>, vector<8x1xf32> -> vector<8x128xf32>
    %173 = tpu.concatenate %169, %172 in 0 : vector<8x128xf32>, vector<8x128xf32> -> vector<16x128xf32>
    %cst_55 = arith.constant dense<0.000000e+00> : vector<8x128xf32>
    %174 = tpu.matmul %13, %173, %cst_55 {dimension_numbers = #tpu.dot_dimension_numbers<[1], [0], [0], [1], [0, 0, 1, 1], [], []>} : vector<8x16xf32>, vector<16x128xf32>, vector<8x128xf32> -> vector<8x128xf32>
    %175 = vector.broadcast %14 : vector<8x1xf32> to vector<8x128xf32>
    %176 = arith.addf %174, %175 : vector<8x128xf32>
    %cst_56 = arith.constant 0.000000e+00 : f32
    %177 = vector.broadcast %cst_56 : f32 to vector<8x128xf32>
    %178 = arith.maximumf %176, %177 : vector<8x128xf32>
    %cst_57 = arith.constant dense<0.000000e+00> : vector<8x128xf32>
    %179 = tpu.matmul %15, %127, %cst_57 {dimension_numbers = #tpu.dot_dimension_numbers<[1], [0], [0], [1], [0, 0, 1, 1], [], []>} : vector<8x8xf32>, vector<8x128xf32>, vector<8x128xf32> -> vector<8x128xf32>
    %180 = vector.broadcast %16 : vector<8x1xf32> to vector<8x128xf32>
    %181 = arith.addf %179, %180 : vector<8x128xf32>
    %cst_58 = arith.constant 0.000000e+00 : f32
    %182 = vector.broadcast %cst_58 : f32 to vector<8x128xf32>
    %183 = arith.maximumf %181, %182 : vector<8x128xf32>
    %184 = arith.addf %178, %183 : vector<8x128xf32>
    %cst_59 = arith.constant dense<0.000000e+00> : vector<8x128xf32>
    %185 = tpu.matmul %184, %18, %cst_59 {dimension_numbers = #tpu.dot_dimension_numbers<[1], [0], [0], [1], [0, 0, 1, 1], [], []>} : vector<8x128xf32>, vector<128x128xf32>, vector<8x128xf32> -> vector<8x128xf32>
    %cst_60 = arith.constant dense<0.000000e+00> : vector<8x128xf32>
    %186 = tpu.matmul %19, %185, %cst_60 {dimension_numbers = #tpu.dot_dimension_numbers<[1], [0], [0], [1], [0, 0, 1, 1], [], []>} : vector<8x8xf32>, vector<8x128xf32>, vector<8x128xf32> -> vector<8x128xf32>
    %187 = vector.broadcast %20 : vector<8x1xf32> to vector<8x128xf32>
    %188 = arith.addf %186, %187 : vector<8x128xf32>
    %c0_61 = arith.constant 0 : index
    %c0_62 = arith.constant 0 : index
    %189 = vector.load %arg22[%c0_61, %c0_62] : memref<8x128xf32, #tpu.memory_space<vmem>>, vector<8x128xf32>
    tpu.vector_store %arg22[%c0_61, %c0_62], %188 {strides = array<i32>} : memref<8x128xf32, #tpu.memory_space<vmem>>, vector<8x128xf32>,
    return
  }
}

</mosaic_0001>

<bundles_post_ra>
// kernel: forward.1
= control target key start
LH: loop header
LB: loop body
LE: loop exit
PB: predicated region body
PF: predicated region fallthrough
CT: control target
= control target key end

     0   :  { %s2309_s0 = inlined_call_operand.vmem [shape: f32[8,128], index: 0, kind: input, shape index: {}]   ;;  %s2310_s1 = inlined_call_operand.hbm [shape: f32[8,8], index: 1, kind: input, shape index: {}]   ;;  %s2311_s2 = inlined_call_operand.hbm [shape: f32[8,72], index: 2, kind: input, shape index: {}]   ;;  %s2312_s3 = inlined_call_operand.hbm [shape: f32[8,32], index: 3, kind: input, shape index: {}]   ;;  %s2313_s4 = inlined_call_operand.hbm [shape: f32[8,16], index: 4, kind: input, shape index: {}]   ;;  %s2314_s5 = inlined_call_operand.vmem [shape: f32[8,1], index: 5, kind: input, shape index: {}, may-alias: {5,10,15,17}]   ;;  %s2315_s6 = inlined_call_operand.vmem [shape: f32[8,8], index: 6, kind: input, shape index: {}]   ;;  %s2316_s7 = inlined_call_operand.vmem [shape: f32[8,72], index: 7, kind: input, shape index: {}]   ;;  %s2317_s8 = inlined_call_operand.vmem [shape: f32[8,32], index: 8, kind: input, shape index: {}]   ;;  %s2318_s9 = inlined_call_operand.vmem [shape: f32[8,16], index: 9, kind: input, shape index: {}]   ;;  %s2319_s10 = inlined_call_operand.vmem [shape: f32[8,1], index: 10, kind: input, shape index: {}, may-alias: {5,10,15,17}]   ;;  %s2320_s11 = inlined_call_operand.vmem [shape: f32[8,8], index: 11, kind: input, shape index: {}]   ;;  %s2321_s12 = inlined_call_operand.vmem [shape: f32[8,72], index: 12, kind: input, shape index: {}]   ;;  %s2322_s13 = inlined_call_operand.vmem [shape: f32[8,32], index: 13, kind: input, shape index: {}]   ;;  %s2323_s14 = inlined_call_operand.vmem [shape: f32[8,16], index: 14, kind: input, shape index: {}]   ;;  %s2324_s15 = inlined_call_operand.vmem [shape: f32[8,1], index: 15, kind: input, shape index: {}, may-alias: {5,10,15,17}]   ;;  %s2325_s16 = inlined_call_operand.vmem [shape: f32[8,8], index: 16, kind: input, shape index: {}]   ;;  %s2326_s17 = inlined_call_operand.vmem [shape: f32[8,1], index: 17, kind: input, shape index: {}, may-alias: {5,10,15,17}]   ;;  %s2327_s18 = inlined_call_operand.vmem [shape: f32[1,128], index: 18, kind: input, shape index: {}]   ;;  %s2328_s19 = inlined_call_operand.hbm [shape: f32[128,128], index: 19, kind: input, shape index: {}]   ;;  %s2329_s20 = inlined_call_operand.vmem [shape: f32[8,8], index: 20, kind: input, shape index: {}]   ;;  %s2330_s21 = inlined_call_operand.vmem [shape: f32[8,1], index: 21, kind: input, shape index: {}]   ;;  %s2331_s22 = inlined_call_operand.vmem [shape: f32[8,128], index: 22, kind: output, shape index: {}]  }
   0x1   :  { %2336 = sst [smem:[#allocation13_spill]] %s2309_s0 }
   0x2   :  { %2337 = sst [smem:[#allocation14_spill]] %s2310_s1 }
   0x3   :  { %2338 = sst [smem:[#allocation15_spill]] %s2311_s2 }
   0x4   :  { %2339 = sst [smem:[#allocation16_spill]] %s2312_s3 }
   0x5   :  { %2340 = sst [smem:[#allocation17_spill]] %s2313_s4 }
   0x6   :  { %2341 = sst [smem:[#allocation18_spill]] %s2314_s5 }
   0x7   :  { %2342 = sst [smem:[#allocation19_spill]] %s2315_s6 }
   0x8   :  { %2343 = sst [smem:[#allocation20_spill]] %s2331_s22 }
   0x9   :  { %27 = vsyncpa [#allocation3], 0 }
   0xa   :  { %28 = vsyncpa [#allocation5], 0 }
   0xb   :  { %29 = vsyncpa [#allocation8], 0  ;;  %s1930_s3 = smov [#allocation4]   ;;  %s1931_s29 = smov [#allocation7]  }
   0xc   :  { %s48_s28 = sshll.u32 %s1930_s3, 4  ;;  %s68_s30 = sshll.u32 %s1931_s29, 4  ;;  %s49_s28 = int_to_ptr.vmem [resolvable:$true] %s48_s28  ;;  %s69_s30 = int_to_ptr.vmem [resolvable:$true] %s68_s30 }
   0xd   :  { %s2344_s23 = sld [smem:[#allocation15_spill]] }
  0x13   :  { %s1814_s1 = scalar_lea.hbm %s2344_s23, 128 }
  0x14   :  { %p1815_p0 = scmp.ne.s32.totalorder %s2344_s23, %s1814_s1  ;;  %p1818_p1 = scmp.lt.u32.totalorder %s1814_s1, %s2344_s23 }
  0x16   :  { %p1820_p2 = pnand %p1818_p1, %p1815_p0 }
  0x18   :  { %1823 = shalt.err (!%p1820_p2)
}
  0x19   :  { %s1824_s26 = scalar_lea.vmem %s49_s28, 128  ;;  %p1829_p4 = scmp.lt.s32.totalorder %s49_s28, %s49_s28 }
  0x1a   :  { %p1825_p3 = scmp.ne.s32.totalorder %s49_s28, %s1824_s26  ;;  %p1830_p5 = scmp.lt.s32.totalorder %s1824_s26, %s1824_s26 }
  0x1c   :  { %p1831_p6 = por %p1830_p5, %p1829_p4 }
  0x1e   :  { %p1832_p7 = pnand %p1831_p6, %p1825_p3 }
  0x20   :  { %1835 = shalt.err (!%p1832_p7)
}
  0x21   :  { %51 = dma.hbm_to_vmem [thread:$0]  %s2344_s23, 128, %s49_s28, [#allocation5]  }
  0x22   :  { %s2345_s4 = sld [smem:[#allocation17_spill]] }
  0x28   :  { %s1836_s0 = scalar_lea.hbm %s2345_s4, 128 }
  0x29   :  { %p1837_p8 = scmp.ne.s32.totalorder %s2345_s4, %s1836_s0  ;;  %p1840_p9 = scmp.lt.u32.totalorder %s1836_s0, %s2345_s4 }
  0x2b   :  { %p1842_p10 = pnand %p1840_p9, %p1837_p8 }
  0x2d   :  { %1845 = shalt.err (!%p1842_p10)
}
  0x2e   :  { %s1846_s25 = scalar_lea.vmem %s69_s30, 128  ;;  %p1851_p12 = scmp.lt.s32.totalorder %s69_s30, %s69_s30 }
  0x2f   :  { %p1847_p11 = scmp.ne.s32.totalorder %s69_s30, %s1846_s25  ;;  %p1852_p13 = scmp.lt.s32.totalorder %s1846_s25, %s1846_s25 }
  0x31   :  { %p1853_p0 = por %p1852_p13, %p1851_p12 }
  0x33   :  { %p1854_p1 = pnand %p1853_p0, %p1847_p11 }
  0x35   :  { %1857 = shalt.err (!%p1854_p1)
}
  0x36   :  { %71 = dma.hbm_to_vmem [thread:$0]  %s2345_s4, 128, %s69_s30, [#allocation8]  }
  0x37   :  { %s1932_s26 = smov [#allocation2]   ;;  %s1933_s27 = smov [#allocation6]  }
  0x38   :  { %s38_s2 = sshll.u32 %s1932_s26, 4  ;;  %s58_s3 = sshll.u32 %s1933_s27, 4  ;;  %s39_s2 = int_to_ptr.vmem [resolvable:$true] %s38_s2  ;;  %s59_s3 = int_to_ptr.vmem [resolvable:$true] %s58_s3 }
  0x39   :  { %s2346_s5 = sld [smem:[#allocation14_spill]] }
  0x3f   :  { %s1858_s24 = scalar_lea.hbm %s2346_s5, 128 }
  0x40   :  { %p1859_p2 = scmp.ne.s32.totalorder %s2346_s5, %s1858_s24  ;;  %p1862_p3 = scmp.lt.u32.totalorder %s1858_s24, %s2346_s5 }
  0x42   :  { %p1864_p4 = pnand %p1862_p3, %p1859_p2 }
  0x44   :  { %1867 = shalt.err (!%p1864_p4)
}
  0x45   :  { %s1868_s30 = scalar_lea.vmem %s39_s2, 128  ;;  %p1873_p6 = scmp.lt.s32.totalorder %s39_s2, %s39_s2 }
  0x46   :  { %p1869_p5 = scmp.ne.s32.totalorder %s39_s2, %s1868_s30  ;;  %p1874_p7 = scmp.lt.s32.totalorder %s1868_s30, %s1868_s30 }
  0x48   :  { %p1875_p8 = por %p1874_p7, %p1873_p6 }
  0x4a   :  { %p1876_p9 = pnand %p1875_p8, %p1869_p5 }
  0x4c   :  { %1879 = shalt.err (!%p1876_p9)
}
  0x4d   :  { %41 = dma.hbm_to_vmem [thread:$0]  %s2346_s5, 128, %s39_s2, [#allocation3]  }
  0x4e   :  { %s2347_s27 = sld [smem:[#allocation16_spill]] }
  0x54   :  { %s1880_s29 = scalar_lea.hbm %s2347_s27, 128 }
  0x55   :  { %p1881_p10 = scmp.ne.s32.totalorder %s2347_s27, %s1880_s29  ;;  %p1884_p11 = scmp.lt.u32.totalorder %s1880_s29, %s2347_s27 }
  0x57   :  { %p1886_p12 = pnand %p1884_p11, %p1881_p10 }
  0x59   :  { %1889 = shalt.err (!%p1886_p12)
}
  0x5a   :  { %s1890_s6 = scalar_lea.vmem %s59_s3, 128  ;;  %p1895_p0 = scmp.lt.s32.totalorder %s59_s3, %s59_s3 }
  0x5b   :  { %p1891_p13 = scmp.ne.s32.totalorder %s59_s3, %s1890_s6  ;;  %p1896_p1 = scmp.lt.s32.totalorder %s1890_s6, %s1890_s6 }
  0x5d   :  { %p1897_p2 = por %p1896_p1, %p1895_p0 }
  0x5f   :  { %p1898_p3 = pnand %p1897_p2, %p1891_p13 }
  0x61   :  { %1901 = shalt.err (!%p1898_p3)
}
  0x62   :  { %61 = dma.hbm_to_vmem [thread:$0]  %s2347_s27, 128, %s59_s3, [#allocation5]  }
  0x63   :  { %s1934_s25 = smov [#allocation9]   ;;  %s1902_s23 = scalar_lea.hbm %s2328_s19, 2048 }
  0x64   :  { %s105_s30 = sshll.u32 %s1934_s25, 4  ;;  %p1903_p4 = scmp.ne.s32.totalorder %s2328_s19, %s1902_s23  ;;  %s106_s30 = int_to_ptr.vmem [resolvable:$true] %s105_s30 }
  0x65   :  { %p1906_p5 = scmp.lt.u32.totalorder %s1902_s23, %s2328_s19 }
  0x67   :  { %p1908_p6 = pnand %p1906_p5, %p1903_p4 }
  0x69   :  { %1911 = shalt.err (!%p1908_p6)
}
  0x6a   :  { %s1912_s24 = scalar_lea.vmem %s106_s30, 2048  ;;  %p1917_p8 = scmp.lt.s32.totalorder %s106_s30, %s106_s30 }
  0x6b   :  { %p1913_p7 = scmp.ne.s32.totalorder %s106_s30, %s1912_s24  ;;  %p1918_p9 = scmp.lt.s32.totalorder %s1912_s24, %s1912_s24 }
  0x6d   :  { %p1919_p10 = por %p1918_p9, %p1917_p8 }
  0x6f   :  { %p1920_p11 = pnand %p1919_p10, %p1913_p7 }
  0x71   :  { %1923 = shalt.err (!%p1920_p11)
}
  0x72   :  { %s1935_s3 = smov 128   ;;  %s1936_s27 = smov 8  }
  0x73   :  { %111 = dma.hbm_to_vmem [thread:$0]  %s2328_s19, 2048, %s106_s30, [#allocation8], %s1935_s3, %s1935_s3, %s1936_s27  }
  0x74   :  { %1924 = dma.done.wait [#allocation3], 128  }
  0x75   :  { %1925 = vsyncadd [#allocation3], 4294967168 }
  0x76   :  { %1926 = dma.done.wait [#allocation5], 256  }
  0x77   :  { %1927 = vsyncadd [#allocation5], 4294967040 }
  0x78   :  { %1928 = dma.done.wait [#allocation8], 2176  }
  0x79   :  { %1929 = vsyncadd [#allocation8], 4294965120  ;;  %v1937_v0 = vmov 0.0   ;;  %vm1938_vm0 = vmmov 0   ;;  %vm168_vm1 = vcmask 64512   ;;  %s2348_s19 = sld [smem:[#allocation13_spill]] }
  0x7a   :  { %1529 = vmatprep.subr.mxu0 %v1937_v0  ;;  %1531 = vmatprep.mubr.msk.f32.mxu0 %vm1938_vm0, %v1937_v0  ;;  %v131_v2 = vld [vmem:[#allocation2] sm:$0xff]  ;;  %v1939_v3 = vmov 0.0|0.0   ;;  %s1940_s25 = smov 2   ;;  %s1941_s30 = smov 4   ;;  %v132_v17 = vld [vmem:[#allocation4] sm:$0xff]  ;;  %vm267_vm2 = vcmask 588800  }
  0x7b   :  { %1552 = vmatprep.mubr.msk.f32.mxu1 %vm1938_vm0, %v1937_v0  ;;  %1706 = vmatprep.subr.bf16.mxu1 %v1939_v3  ;;  %s1942_s4 = smov 1   ;;  %s1943_s28 = smov 3   ;;  %v2156_v19 = vld [vmem:[%s2327_s18] ss:$0 sm:$0xff]  ;;  %v133_v28 = vld [vmem:[#allocation6] sm:$0xff]  ;;  %vm358_vm3 = vcmask 261120  }
  0x7c   :  { %s1944_s23 = smov 126   ;;  %s1945_s26 = smov 127   ;;  %v1948_v30 = vmov 0   ;;  %v134_v36 = vld [vmem:[#allocation7] sm:$0xff]  ;;  %vm442_vm4 = vcmask 130048   ;;  %v137_v57 = vld [vmem:[%s2316_s7] sm:$0xff] }
  0x7d   :  { %s1946_s29 = smov 124   ;;  %s1947_s0 = smov 125   ;;  %1812 = vset.pattern.permute.xlu0 %v1948_v30  ;;  %1813 = vset.pattern.permute.xlu1 %v1948_v30  ;;  %v140_v62 = vld [vmem:[%s2319_s10] sm:$0xff] }
  0x7e   :  { %s2349_s27 = sld [smem:[#allocation18_spill]]  ;;  %s2350_s2 = sld [smem:[#allocation19_spill]] }
  0x7f   :  { %v167_v1 = vld [vmem:[%s2348_s19] sm:$0xff]  ;;  %s2351_s6 = sld [smem:[#allocation20_spill]] }
  0x80   :  { %1530 = vmatpush3.msra.mxu0 %v167_v1 }
  0x81   :  { %1532 = vmatmul.mubr.msk.f32.vlgmr.msra.gmra.mrb[0].mxu0 %vm168_vm1, %v131_v2  ;;  %1718 = vmatprep.subr.bf16.mxu0 %v1939_v3 }
  0x82   :  { %1563 = vmatprep.mubr.msk.f32.mxu0 %vm1938_vm0, %v1937_v0 }
  0x84   :  { %v135_v29 = vld [vmem:[%s2349_s27] sm:$0xff] }
  0x85   :  { %v136_v43 = vld [vmem:[%s2350_s2] sm:$0xff] }
 0x154   :  { %v238_v4 = vpop.f32.mrb[0].mxu0 }
 0x155   :  { %249 = vrot.lane.b32.xlu1 %v238_v4, %s1940_s25  ;;  %243 = vrot.lane.b32.xlu0 %v238_v4, %s1941_s30  ;;  %v1533_v5 = vpop.f32.mrb[1].mxu0 }
 0x159   :  { %252 = vrot.lane.b32.xlu1 %v238_v4, %s1942_s4  ;;  %246 = vrot.lane.b32.xlu0 %v238_v4, %s1943_s28 }
 0x15d   :  { %258 = vrot.lane.b32.xlu1 %v238_v4, %s1944_s23  ;;  %255 = vrot.lane.b32.xlu0 %v238_v4, %s1945_s26 }
 0x161   :  { %264 = vrot.lane.b32.xlu1 %v238_v4, %s1946_s29  ;;  %261 = vrot.lane.b32.xlu0 %v238_v4, %s1947_s0 }
 0x1c7   :  { %v250_v6 = vpop.permute.xlu1 %249  ;;  %v244_v7 = vpop.permute.xlu0 %243 }
 0x1cb   :  { %v247_v8 = vpop.permute.xlu0 %246  ;;  %v253_v10 = vpop.permute.xlu1 %252 }
 0x1cc   :  { %v1707_v9 = vpack.c.bf16 %v247_v8, %v244_v7  ;;  %v1710_v12 = vpack.c.bf16 %v253_v10, %v250_v6  ;;  %v138_v6 = vld [vmem:[%s2317_s8] sm:$0xff] }
 0x1ce   :  { %1708 = vmatpush3.bf16.msra.mxu1 %v1707_v9 }
 0x1cf   :  { %v256_v11 = vpop.permute.xlu0 %255  ;;  %1709 = vmatprep.subr.bf16.mxu1 %v1939_v3  ;;  %v259_v15 = vpop.permute.xlu1 %258 }
 0x1d0   :  { %v1713_v13 = vpack.c.bf16 %v256_v11, %v238_v4 }
 0x1d2   :  { %1711 = vmatpush3.bf16.msra.mxu1 %v1710_v12  ;;  %v139_v12 = vld [vmem:[%s2318_s9] sm:$0xff] }
 0x1d3   :  { %1712 = vmatprep.subr.bf16.mxu1 %v1939_v3  ;;  %v262_v14 = vpop.permute.xlu0 %261  ;;  %v265_v18 = vpop.permute.xlu1 %264 }
 0x1d4   :  { %v1716_v16 = vpack.c.bf16 %v262_v14, %v259_v15 }
 0x1d6   :  { %1714 = vmatpush3.bf16.msra.mxu1 %v1713_v13 }
 0x1d7   :  { %1715 = vmatprep.subr.bf16.mxu1 %v1939_v3 }
 0x1da   :  { %1717 = vmatpush3.bf16.msra.mxu1 %v1716_v16 }
 0x1db   :  { %1550 = vmatprep.subr.mxu1 %v1937_v0 }
 0x1de   :  { %1551 = vmatpush3.msra.mxu1 %v265_v18 }
 0x1df   :  { %1553 = vmatmul.mubr.msk.f32.vlgmr.msra.gmra.mrb[0].mxu1 %vm267_vm2, %v132_v17  ;;  %1727 = vmatprep.subr.bf16.mxu1 %v1939_v3 }
 0x1e0   :  { %1596 = vmatprep.mubr.msk.f32.mxu1 %vm1938_vm0, %v1937_v0 }
 0x2b2   :  { %v337_v20 = vpop.f32.mrb[0].mxu1 }
 0x2b3   :  { %v347_v21 = vmul.f32 %v2156_v19, %v337_v20  ;;  %v1554_v22 = vpop.f32.mrb[1].mxu1  ;;  %v141_v20 = vld [vmem:[%s2320_s11] sm:$0xff] }
 0x2b5   :  { %352 = vrot.lane.b32.xlu1 %v347_v21, %s1945_s26  ;;  %349 = vrot.lane.b32.xlu0 %v347_v21, %s1942_s4 }
 0x2b9   :  { %355 = vrot.lane.b32.xlu0 %v347_v21, %s1944_s23 }
 0x2bd   :  { %439 = vperm.xlu0 %1812, %v135_v29  }
 0x327   :  { %v350_v23 = vpop.permute.xlu0 %349  ;;  %v353_v25 = vpop.permute.xlu1 %352 }
 0x328   :  { %v1719_v24 = vpack.c.bf16 %v347_v21, %v350_v23 }
 0x32a   :  { %1720 = vmatpush3.bf16.msra.mxu0 %v1719_v24 }
 0x32b   :  { %v356_v26 = vpop.permute.xlu0 %355  ;;  %1721 = vmatprep.subr.bf16.mxu0 %v1939_v3 }
 0x32c   :  { %v1722_v27 = vpack.c.bf16 %v356_v26, %v353_v25 }
 0x32e   :  { %1723 = vmatpush3.bf16.msra.mxu0 %v1722_v27 }
 0x32f   :  { %1724 = vmatprep.subr.bf16.mxu0 %v1939_v3 }
 0x331   :  { %1564 = vmatmul.mubr.msk.f32.vlgmr.msra.gmra.mrb[2].mxu0 %vm358_vm3, %v133_v28 }
 0x332   :  { %1570 = vmatprep.mubr.msk.f32.mxu0 %vm1938_vm0, %v1937_v0 }
 0x33c   :  { %v440_v37 = vpop.permute.xlu0 %439 }
 0x404   :  { %v428_v31 = vpop.f32.mrb[2].mxu0 }
 0x405   :  { %v432_v32 = vmul.f32 %v2156_v19, %v428_v31  ;;  %v1565_v33 = vpop.f32.mrb[3].mxu0 }
 0x407   :  { %434 = vrot.lane.b32.xlu1 %v432_v32, %s1945_s26 }
 0x479   :  { %v435_v34 = vpop.permute.xlu1 %434 }
 0x47a   :  { %v1725_v35 = vpack.c.bf16 %v435_v34, %v432_v32  ;;  %v142_v34 = vld [vmem:[%s2321_s12] sm:$0xff] }
 0x47c   :  { %1726 = vmatpush3.bf16.msra.mxu0 %v1725_v35 }
 0x47d   :  { %1573 = vmatprep.subr.mxu0 %v1937_v0 }
 0x47f   :  { %1571 = vmatmul.mubr.msk.f32.vlgmr.msra.gmra.mrb[4].mxu0 %vm442_vm4, %v134_v36 }
 0x480   :  { %1575 = vmatprep.mubr.msk.f32.mxu0 %vm1938_vm0, %v1937_v0 }
 0x552   :  { %v512_v38 = vpop.f32.mrb[4].mxu0 }
 0x553   :  { %v513_v39 = vadd.f32 %v512_v38, %v440_v37  ;;  %v1572_v40 = vpop.f32.mrb[5].mxu0 }
 0x555   :  { %v516_v41 = vmax.f32 %v513_v39, 0.0 }
 0x557   :  { %v517_v42 = vmul.f32 %v2156_v19, %v516_v41 }
 0x559   :  { %1574 = vmatpush3.msra.mxu0 %v517_v42 }
 0x55a   :  { %1576 = vmatmul.mubr.msk.f32.vlgmr.msra.gmra.mrb[6].mxu0 %vm168_vm1, %v136_v43  ;;  %1745 = vmatprep.subr.bf16.mxu0 %v1939_v3 }
 0x55b   :  { %1614 = vmatprep.mubr.msk.f32.mxu0 %vm1938_vm0, %v1937_v0 }
 0x62d   :  { %v587_v44 = vpop.f32.mrb[6].mxu0 }
 0x62e   :  { %598 = vrot.lane.b32.xlu0 %v587_v44, %s1940_s25  ;;  %592 = vrot.lane.b32.xlu1 %v587_v44, %s1941_s30  ;;  %v1577_v45 = vpop.f32.mrb[7].mxu0 }
 0x632   :  { %604 = vrot.lane.b32.xlu0 %v587_v44, %s1945_s26  ;;  %595 = vrot.lane.b32.xlu1 %v587_v44, %s1943_s28 }
 0x636   :  { %610 = vrot.lane.b32.xlu0 %v587_v44, %s1947_s0  ;;  %601 = vrot.lane.b32.xlu1 %v587_v44, %s1942_s4 }
 0x63a   :  { %607 = vrot.lane.b32.xlu1 %v587_v44, %s1944_s23 }
 0x63e   :  { %613 = vrot.lane.b32.xlu1 %v587_v44, %s1946_s29 }
 0x6a0   :  { %v593_v46 = vpop.permute.xlu1 %592  ;;  %v599_v47 = vpop.permute.xlu0 %598 }
 0x6a4   :  { %v596_v48 = vpop.permute.xlu1 %595  ;;  %v605_v52 = vpop.permute.xlu0 %604 }
 0x6a5   :  { %v1728_v49 = vpack.c.bf16 %v596_v48, %v593_v46  ;;  %v1734_v53 = vpack.c.bf16 %v605_v52, %v587_v44  ;;  %v143_v44 = vld [vmem:[%s2322_s13] sm:$0xff] }
 0x6a6   :  { %v147_v48 = vld [vmem:[%s2326_s17] sm:$0xff] }
 0x6a7   :  { %1729 = vmatpush3.bf16.msra.mxu1 %v1728_v49  ;;  %v145_v49 = vld [vmem:[%s2324_s15] sm:$0xff] }
 0x6a8   :  { %v602_v50 = vpop.permute.xlu1 %601  ;;  %1730 = vmatprep.subr.bf16.mxu1 %v1939_v3  ;;  %v611_v55 = vpop.permute.xlu0 %610  ;;  %v144_v52 = vld [vmem:[%s2323_s14] sm:$0xff] }
 0x6a9   :  { %v1731_v51 = vpack.c.bf16 %v602_v50, %v599_v47  ;;  %v166_v50 = vld [vmem:[%s2330_s21] sm:$0xff] }
 0x6ab   :  { %1732 = vmatpush3.bf16.msra.mxu1 %v1731_v51 }
 0x6ac   :  { %1733 = vmatprep.subr.bf16.mxu1 %v1939_v3  ;;  %v608_v54 = vpop.permute.xlu1 %607 }
 0x6ad   :  { %v1737_v56 = vpack.c.bf16 %v611_v55, %v608_v54  ;;  %v150_v54 = vld [vmem:[#allocation9 + $0x8] sm:$0xff]  ;;  %v146_v55 = vld [vmem:[%s2325_s16] sm:$0xff] }
 0x6af   :  { %1735 = vmatpush3.bf16.msra.mxu1 %v1734_v53  ;;  %v149_v53 = vld [vmem:[#allocation9] sm:$0xff] }
 0x6b0   :  { %1736 = vmatprep.subr.bf16.mxu1 %v1939_v3  ;;  %v614_v58 = vpop.permute.xlu1 %613 }
 0x6b3   :  { %1738 = vmatpush3.bf16.msra.mxu1 %v1737_v56  ;;  %v1770_v56 = vpack.c.bf16 %v150_v54, %v149_v53 }
 0x6b4   :  { %1594 = vmatprep.subr.mxu1 %v1937_v0 }
 0x6b7   :  { %1595 = vmatpush3.msra.mxu1 %v614_v58  ;;  %v152_v58 = vld [vmem:[#allocation9 + $0x18] sm:$0xff] }
 0x6b8   :  { %1597 = vmatmul.mubr.msk.f32.vlgmr.msra.gmra.mrb[2].mxu1 %vm267_vm2, %v137_v57  ;;  %1739 = vmatprep.subr.bf16.mxu1 %v1939_v3  ;;  %v151_v57 = vld [vmem:[#allocation9 + $0x10] sm:$0xff] }
 0x6b9   :  { %1607 = vmatprep.mubr.msk.f32.mxu1 %vm1938_vm0, %v1937_v0 }
 0x78b   :  { %v685_v59 = vpop.f32.mrb[2].mxu1 }
 0x78c   :  { %v689_v60 = vmul.f32 %v2156_v19, %v685_v59  ;;  %v1598_v61 = vpop.f32.mrb[3].mxu1  ;;  %v1773_v59 = vpack.c.bf16 %v152_v58, %v151_v57 }
 0x78d   :  { %v154_v61 = vld [vmem:[#allocation9 + $0x28] sm:$0xff] }
 0x78e   :  { %694 = vrot.lane.b32.xlu1 %v689_v60, %s1945_s26  ;;  %691 = vrot.lane.b32.xlu0 %v689_v60, %s1942_s4 }
 0x792   :  { %697 = vrot.lane.b32.xlu0 %v689_v60, %s1944_s23 }
 0x796   :  { %780 = vperm.xlu0 %1812, %v140_v62  }
 0x800   :  { %v692_v63 = vpop.permute.xlu0 %691  ;;  %v695_v2 = vpop.permute.xlu1 %694 }
 0x801   :  { %v1740_v1 = vpack.c.bf16 %v689_v60, %v692_v63  ;;  %v153_v60 = vld [vmem:[#allocation9 + $0x20] sm:$0xff]  ;;  %v155_v63 = vld [vmem:[#allocation9 + $0x30] sm:$0xff] }
 0x802   :  { %v1776_v62 = vpack.c.bf16 %v154_v61, %v153_v60 }
 0x803   :  { %1741 = vmatpush3.bf16.msra.mxu1 %v1740_v1  ;;  %v156_v1 = vld [vmem:[#allocation9 + $0x38] sm:$0xff] }
 0x804   :  { %v698_v4 = vpop.permute.xlu0 %697  ;;  %1742 = vmatprep.subr.bf16.mxu1 %v1939_v3 }
 0x805   :  { %v1743_v5 = vpack.c.bf16 %v698_v4, %v695_v2  ;;  %v1779_v2 = vpack.c.bf16 %v156_v1, %v155_v63  ;;  %v157_v4 = vld [vmem:[#allocation9 + $0x40] sm:$0xff] }
 0x807   :  { %1744 = vmatpush3.bf16.msra.mxu1 %v1743_v5  ;;  %v158_v5 = vld [vmem:[#allocation9 + $0x48] sm:$0xff] }
 0x808   :  { %1617 = vmatprep.subr.mxu1 %v1937_v0 }
 0x80a   :  { %1608 = vmatmul.mubr.msk.f32.vlgmr.msra.gmra.mrb[4].mxu1 %vm358_vm3, %v138_v6  ;;  %v1782_v6 = vpack.c.bf16 %v158_v5, %v157_v4 }
 0x80b   :  { %1619 = vmatprep.mubr.msk.f32.mxu1 %vm1938_vm0, %v1937_v0 }
 0x815   :  { %v781_v13 = vpop.permute.xlu0 %780 }
 0x8dd   :  { %v769_v7 = vpop.f32.mrb[4].mxu1 }
 0x8de   :  { %v773_v8 = vmul.f32 %v2156_v19, %v769_v7  ;;  %v1609_v9 = vpop.f32.mrb[5].mxu1  ;;  %v160_v7 = vld [vmem:[#allocation9 + $0x58] sm:$0xff] }
 0x8df   :  { %v161_v9 = vld [vmem:[#allocation9 + $0x60] sm:$0xff] }
 0x8e0   :  { %775 = vrot.lane.b32.xlu1 %v773_v8, %s1945_s26 }
 0x952   :  { %v776_v10 = vpop.permute.xlu1 %775 }
 0x953   :  { %v1746_v11 = vpack.c.bf16 %v776_v10, %v773_v8  ;;  %v162_v10 = vld [vmem:[#allocation9 + $0x68] sm:$0xff] }
 0x955   :  { %1747 = vmatpush3.bf16.msra.mxu0 %v1746_v11  ;;  %v1788_v11 = vpack.c.bf16 %v162_v10, %v161_v9 }
 0x956   :  { %1760 = vmatprep.subr.bf16.mxu0 %v1939_v3 }
 0x958   :  { %1615 = vmatmul.mubr.msk.f32.vlgmr.msra.gmra.mrb[8].mxu0 %vm442_vm4, %v139_v12  ;;  %v163_v12 = vld [vmem:[#allocation9 + $0x70] sm:$0xff] }
 0x959   :  { %1651 = vmatprep.mubr.msk.f32.mxu0 %vm1938_vm0, %v1937_v0 }
 0xa2b   :  { %v852_v14 = vpop.f32.mrb[8].mxu0 }
 0xa2c   :  { %v853_v15 = vadd.f32 %v852_v14, %v781_v13  ;;  %v1616_v16 = vpop.f32.mrb[9].mxu0  ;;  %v164_v13 = vld [vmem:[#allocation9 + $0x78] sm:$0xff] }
 0xa2d   :  { %v1791_v14 = vpack.c.bf16 %v164_v13, %v163_v12 }
 0xa2e   :  { %v856_v17 = vmax.f32 %v853_v15, 0.0 }
 0xa30   :  { %v2228_v18 = vmul.f32 %v2156_v19, %v856_v17 }
 0xa32   :  { %1618 = vmatpush3.msra.mxu1 %v2228_v18 }
 0xa33   :  { %1620 = vmatmul.mubr.msk.f32.vlgmr.msra.gmra.mrb[6].mxu1 %vm168_vm1, %v141_v20  ;;  %1748 = vmatprep.subr.bf16.mxu1 %v1939_v3 }
 0xa34   :  { %1640 = vmatprep.mubr.msk.f32.mxu1 %vm1938_vm0, %v1937_v0 }
 0xb06   :  { %v927_v21 = vpop.f32.mrb[6].mxu1 }
 0xb07   :  { %935 = vrot.lane.b32.xlu0 %v927_v21, %s1943_s28  ;;  %932 = vrot.lane.b32.xlu1 %v927_v21, %s1941_s30  ;;  %v1621_v22 = vpop.f32.mrb[7].mxu1 }
 0xb0b   :  { %941 = vrot.lane.b32.xlu0 %v927_v21, %s1942_s4  ;;  %938 = vrot.lane.b32.xlu1 %v927_v21, %s1940_s25 }
 0xb0f   :  { %947 = vrot.lane.b32.xlu0 %v927_v21, %s1944_s23  ;;  %944 = vrot.lane.b32.xlu1 %v927_v21, %s1945_s26 }
 0xb13   :  { %953 = vrot.lane.b32.xlu0 %v927_v21, %s1946_s29  ;;  %950 = vrot.lane.b32.xlu1 %v927_v21, %s1947_s0 }
 0xb79   :  { %v936_v23 = vpop.permute.xlu0 %935  ;;  %v933_v24 = vpop.permute.xlu1 %932 }
 0xb7a   :  { %v1749_v25 = vpack.c.bf16 %v936_v23, %v933_v24 }
 0xb7c   :  { %1750 = vmatpush3.bf16.msra.mxu1 %v1749_v25 }
 0xb7d   :  { %v942_v26 = vpop.permute.xlu0 %941  ;;  %v939_v27 = vpop.permute.xlu1 %938  ;;  %1751 = vmatprep.subr.bf16.mxu1 %v1939_v3 }
 0xb7e   :  { %v1752_v28 = vpack.c.bf16 %v942_v26, %v939_v27 }
 0xb80   :  { %1753 = vmatpush3.bf16.msra.mxu1 %v1752_v28 }
 0xb81   :  { %v945_v29 = vpop.permute.xlu1 %944  ;;  %1754 = vmatprep.subr.bf16.mxu1 %v1939_v3  ;;  %v948_v31 = vpop.permute.xlu0 %947 }
 0xb82   :  { %v1755_v30 = vpack.c.bf16 %v945_v29, %v927_v21 }
 0xb84   :  { %1756 = vmatpush3.bf16.msra.mxu1 %v1755_v30 }
 0xb85   :  { %v951_v32 = vpop.permute.xlu1 %950  ;;  %1757 = vmatprep.subr.bf16.mxu1 %v1939_v3  ;;  %v954_v35 = vpop.permute.xlu0 %953 }
 0xb86   :  { %v1758_v33 = vpack.c.bf16 %v951_v32, %v948_v31 }
 0xb88   :  { %1759 = vmatpush3.bf16.msra.mxu1 %v1758_v33 }
 0xb89   :  { %1638 = vmatprep.subr.mxu1 %v1937_v0 }
 0xb8c   :  { %1639 = vmatpush3.msra.mxu1 %v954_v35 }
 0xb8d   :  { %1641 = vmatmul.mubr.msk.f32.vlgmr.msra.gmra.mrb[8].mxu1 %vm267_vm2, %v142_v34  ;;  %1701 = vmatprep.subr.mxu1 %v1937_v0 }
 0xb8e   :  { %1703 = vmatprep.mubr.msk.f32.mxu1 %vm1938_vm0, %v1937_v0 }
 0xc60   :  { %v1025_v36 = vpop.f32.mrb[8].mxu1 }
 0xc61   :  { %v1029_v37 = vmul.f32 %v2156_v19, %v1025_v36  ;;  %v1642_v38 = vpop.f32.mrb[9].mxu1 }
 0xc63   :  { %1034 = vrot.lane.b32.xlu0 %v1029_v37, %s1945_s26  ;;  %1031 = vrot.lane.b32.xlu1 %v1029_v37, %s1942_s4 }
 0xc67   :  { %1037 = vrot.lane.b32.xlu1 %v1029_v37, %s1944_s23 }
 0xc6b   :  { %1120 = vperm.xlu1 %1813, %v145_v49  }
 0xc6f   :  { %1349 = vperm.xlu1 %1813, %v166_v50  }
 0xcd5   :  { %v1032_v39 = vpop.permute.xlu1 %1031  ;;  %v1035_v41 = vpop.permute.xlu0 %1034 }
 0xcd6   :  { %v1761_v40 = vpack.c.bf16 %v1029_v37, %v1032_v39 }
 0xcd8   :  { %1762 = vmatpush3.bf16.msra.mxu0 %v1761_v40 }
 0xcd9   :  { %v1038_v42 = vpop.permute.xlu1 %1037  ;;  %1763 = vmatprep.subr.bf16.mxu0 %v1939_v3 }
 0xcda   :  { %v1764_v43 = vpack.c.bf16 %v1038_v42, %v1035_v41 }
 0xcdc   :  { %1765 = vmatpush3.bf16.msra.mxu0 %v1764_v43 }
 0xcdd   :  { %1766 = vmatprep.subr.bf16.mxu0 %v1939_v3 }
 0xcdf   :  { %1652 = vmatmul.mubr.msk.f32.vlgmr.msra.gmra.mrb[10].mxu0 %vm358_vm3, %v143_v44 }
 0xce0   :  { %1658 = vmatprep.mubr.msk.f32.mxu0 %vm1938_vm0, %v1937_v0 }
 0xcea   :  { %v1121_v15 = vpop.permute.xlu1 %1120 }
 0xcee   :  { %v1350_v29 = vpop.permute.xlu1 %1349 }
 0xdb2   :  { %v1109_v45 = vpop.f32.mrb[10].mxu0 }
 0xdb3   :  { %v1113_v46 = vmul.f32 %v2156_v19, %v1109_v45  ;;  %v1653_v47 = vpop.f32.mrb[11].mxu0 }
 0xdb5   :  { %1115 = vrot.lane.b32.xlu0 %v1113_v46, %s1945_s26 }
 0xdb9   :  { %1199 = vperm.xlu0 %1812, %v147_v48  }
 0xe27   :  { %v1116_v51 = vpop.permute.xlu0 %1115 }
 0xe28   :  { %v1767_v19 = vpack.c.bf16 %v1116_v51, %v1113_v46 }
 0xe2a   :  { %1768 = vmatpush3.bf16.msra.mxu0 %v1767_v19 }
 0xe2b   :  { %1661 = vmatprep.subr.mxu0 %v1937_v0 }
 0xe2d   :  { %1659 = vmatmul.mubr.msk.f32.vlgmr.msra.gmra.mrb[12].mxu0 %vm442_vm4, %v144_v52 }
 0xe2e   :  { %1662 = vmatpush3.msra.mxu0 %v2228_v18  ;;  %1663 = vmatprep.mubr.msk.f32.mxu0 %vm1938_vm0, %v1937_v0 }
 0xe2f   :  { %1769 = vmatprep.subr.bf16.mxu0 %v1939_v3 }
 0xe31   :  { %1664 = vmatmul.mubr.msk.f32.vlgmr.msra.gmra.mrb[14].mxu0 %vm168_vm1, %v146_v55 }
 0xe32   :  { %1771 = vmatpush3.bf16.msra.mxu0 %v1770_v56  ;;  %1698 = vmatprep.mubr.msk.f32.mxu0 %vm1938_vm0, %v1937_v0  ;;  %v159_v0 = vld [vmem:[#allocation9 + $0x50] sm:$0xff] }
 0xe33   :  { %1772 = vmatprep.subr.bf16.mxu0 %v1939_v3  ;;  %v1785_v8 = vpack.c.bf16 %v160_v7, %v159_v0 }
 0xe36   :  { %1774 = vmatpush3.bf16.msra.mxu0 %v1773_v59 }
 0xe37   :  { %1775 = vmatprep.subr.bf16.mxu0 %v1939_v3 }
 0xe38   :  { %v1200_v20 = vpop.permute.xlu0 %1199 }
 0xe3a   :  { %1777 = vmatpush3.bf16.msra.mxu0 %v1776_v62 }
 0xe3b   :  { %1778 = vmatprep.subr.bf16.mxu0 %v1939_v3 }
 0xe3e   :  { %1780 = vmatpush3.bf16.msra.mxu0 %v1779_v2 }
 0xe3f   :  { %1781 = vmatprep.subr.bf16.mxu0 %v1939_v3 }
 0xe42   :  { %1783 = vmatpush3.bf16.msra.mxu0 %v1782_v6 }
 0xe43   :  { %1784 = vmatprep.subr.bf16.mxu0 %v1939_v3 }
 0xe46   :  { %1786 = vmatpush3.bf16.msra.mxu0 %v1785_v8 }
 0xe47   :  { %1787 = vmatprep.subr.bf16.mxu0 %v1939_v3 }
 0xe4a   :  { %1789 = vmatpush3.bf16.msra.mxu0 %v1788_v11 }
 0xe4b   :  { %1790 = vmatprep.subr.bf16.mxu0 %v1939_v3  ;;  %v165_v3 = vld [vmem:[%s2329_s20] sm:$0xff] }
 0xe4e   :  { %1792 = vmatpush3.bf16.msra.mxu0 %v1791_v14 }
 0xf00   :  { %v1192_v16 = vpop.f32.mrb[12].mxu0 }
 0xf01   :  { %v1660_v17 = vpop.f32.mrb[13].mxu0  ;;  %v1193_v18 = vadd.f32 %v1192_v16, %v1121_v15 }
 0xf03   :  { %v1196_v24 = vmax.f32 %v1193_v18, 0.0 }
 0xf04   :  { %v1271_v21 = vpop.f32.mrb[14].mxu0 }
 0xf05   :  { %v1272_v22 = vadd.f32 %v1271_v21, %v1200_v20  ;;  %v1665_v23 = vpop.f32.mrb[15].mxu0 }
 0xf07   :  { %v1275_v25 = vmax.f32 %v1272_v22, 0.0 }
 0xf09   :  { %v1276_v26 = vadd.f32 %v1275_v25, %v1196_v24 }
 0xf0b   :  { %1699 = vmatmul.mubr.f32.vlgmr.msra.gmra.mrb[16].mxu0 %v1276_v26 }
 0xfde   :  { %v1343_v27 = vpop.f32.mrb[16].mxu0 }
 0xfdf   :  { %v1700_v28 = vpop.f32.mrb[17].mxu0  ;;  %1702 = vmatpush3.msra.mxu1 %v1343_v27 }
 0xfe0   :  { %1704 = vmatmul.mubr.msk.f32.vlgmr.msra.gmra.mrb[10].mxu1 %vm168_vm1, %v165_v3 }
0x10b3   :  { %v1421_v30 = vpop.f32.mrb[10].mxu1 }
0x10b4   :  { %v1422_v31 = vadd.f32 %v1421_v30, %v1350_v29  ;;  %v1705_v32 = vpop.f32.mrb[11].mxu1 }
0x10b6   :  { %1425 = vst [vmem:[%s2351_s6] sm:$0xff] %v1422_v31 }
0x10b7   :  { %1430 = vsyncpa [#allocation3], 1 }
0x10b8   :  { %1431 = vsyncpa [#allocation5], 1 }
0x10b9   :  { %1432 = vsyncpa [#allocation8], 1 }

</bundles_post_ra>
